<compile_context>
chip_gen: v7x
topology: tpu7x:2x2x1
jax: 0.10.0
libtpu: 0.0.40
codegen_flags: <defaults>
</compile_context>

<pallas_src>
import functools

import jax
import jax.numpy as jnp
from jax.experimental import pallas as pl
from jax.experimental.pallas import tpu as pltpu


def recurrent_kernel(x_ref, wih_ref, bih_ref, whh_ref, bhh_ref, tmask_ref,
                     out_ref, proj_scr, proj_og_scr, *, last_layer):
    """One grid step == one category index ii of the serial recurrence."""
    k = pl.program_id(0)

    # Step 0: input projection, computed once and carried in VMEM scratch.
    @pl.when(k == 0)
    def _():
        proj_og = (jnp.dot(x_ref[...], wih_ref[...],
                           preferred_element_type=jnp.float32) + bih_ref[...])
        proj_og_scr[...] = proj_og
        proj_scr[...] = proj_og.astype(jnp.bfloat16)

    # inter = proj @ weight_hh + bias_hh   (bf16 x bf16 -> f32 accumulate)
    inter = (jnp.dot(proj_scr[...], whh_ref[...],
                     preferred_element_type=jnp.float32) + bhh_ref[...])

    # ii == 0: pre = inter ; ii > 0: pre = inter + proj_og   (skip connection)
    og_gate = jnp.where(k > 0, 1.0, 0.0)            # scalar gate, cheap splat-mul
    pre = inter + og_gate * proj_og_scr[...]

    if last_layer:
        # TODO(synk): PyTorch's first_rec_layer+last_layer path leaves `proj`
        # undefined for category_dim > 1 (would raise NameError in torch); we
        # carry sigmoid(pre) forward instead of modeling that error.
        out = jax.nn.sigmoid(pre)
    else:
        # PyTorch: (inter * t[None]).sum(dim=1) reduces over the *batch* axis
        # -> per-unit threshold of shape (1, R). tmask is t broadcast to (Bp, R)
        # with padded rows zeroed, so padded rows' bias-only activations never
        # contaminate the threshold.
        to_thresh = jnp.sum(inter * tmask_ref[...], axis=0, keepdims=True)  # (1, R)
        out = jnp.where(to_thresh >= 0.0, pre, 0.0)                          # (Bp, R)

    out_ref[0] = out                     # dense sublane/lane-aligned (Bp, R) store
    proj_scr[...] = out.astype(jnp.bfloat16)


def _vmem_limit_bytes(buf_bytes):
    cap = 128 * 1024 * 1024
    try:
        info = pltpu.get_tpu_info()
        cap = int(getattr(info, "vmem_capacity_bytes", cap))
    except Exception:
        pass
    # ~20% headroom for compiler-internal scratch; ~2x the explicit buffers
    # (inputs/outputs are double-buffered by the BlockSpec pipeline).
    return int(min(int(0.8 * cap), max(4 * 1024 * 1024, 2 * buf_bytes)))


def recurrent_forward(x, weight_ih, bias_ih, weight_hh, bias_hh, t,
                      *, category_dim, last_layer=False):
    batch, input_size = x.shape
    rnn_dim = weight_hh.shape[0]

    # Pad the batch (sublane dim of the bf16 MXU operands) to a multiple of 16.
    b_pad = max(16, ((batch + 15) // 16) * 16)
    x_p = x.astype(jnp.bfloat16)
    if b_pad != batch:
        x_p = jnp.pad(x_p, ((0, b_pad - batch), (0, 0)))

    wih = weight_ih.astype(jnp.bfloat16)
    whh = weight_hh.astype(jnp.bfloat16)
    bih = bias_ih.reshape(1, -1).astype(jnp.float32)
    bhh = bias_hh.reshape(1, -1).astype(jnp.float32)

    # Hoist the constant threshold operand off the serial per-category chain:
    # t broadcast to (Bp, R) with the validity mask (padded rows = 0) folded in.
    row_valid = (jnp.arange(b_pad) < batch).astype(jnp.float32)[:, None]
    tmask = row_valid * t.reshape(1, -1).astype(jnp.float32)          # (Bp, R)

    in_bytes = sum(int(a.size) * a.dtype.itemsize
                   for a in (x_p, wih, bih, whh, bhh, tmask))
    out_blk_bytes = b_pad * rnn_dim * 4                # one (1, Bp, R) f32 block
    scratch_bytes = b_pad * rnn_dim * (2 + 4)          # proj (bf16) + proj_og (f32)
    vmem_limit = _vmem_limit_bytes(2 * in_bytes + 2 * out_blk_bytes + scratch_bytes)

    kernel = functools.partial(recurrent_kernel, last_layer=last_layer)
    const2 = lambda k: (0, 0)                          # resident inputs (no re-DMA)

    out_kbr = pl.pallas_call(
        kernel,
        out_shape=jax.ShapeDtypeStruct((category_dim, b_pad, rnn_dim), jnp.float32),
        grid=(category_dim,),
        in_specs=[
            pl.BlockSpec((b_pad, input_size), const2),     # x
            pl.BlockSpec((input_size, rnn_dim), const2),   # weight_ih
            pl.BlockSpec((1, rnn_dim), const2),            # bias_ih
            pl.BlockSpec((rnn_dim, rnn_dim), const2),      # weight_hh
            pl.BlockSpec((1, rnn_dim), const2),            # bias_hh
            pl.BlockSpec((b_pad, rnn_dim), const2),        # tmask
        ],
        out_specs=pl.BlockSpec((1, b_pad, rnn_dim), lambda k: (k, 0, 0)),
        scratch_shapes=[
            pltpu.VMEM((b_pad, rnn_dim), jnp.bfloat16),    # proj carry
            pltpu.VMEM((b_pad, rnn_dim), jnp.float32),     # proj_og carry
        ],
        compiler_params=pltpu.CompilerParams(
            dimension_semantics=("arbitrary",),            # serial recurrence over K
            vmem_limit_bytes=vmem_limit),
    )(x_p, wih, bih, whh, bhh, tmask)

    # (K, Bp, R) -> (B, K, R): slice + transpose in the XLA wrapper so in-kernel
    # stores stay dense.
    return jnp.transpose(out_kbr[:, :batch, :], (1, 0, 2))


def recurrent_reference(x, weight_ih, bias_ih, weight_hh, bias_hh, t,
                        *, category_dim, last_layer=False,
                        mxu_dtype=jnp.bfloat16):
    """Pure-JAX reference mirroring the PyTorch forward (first_rec_layer, 2-D input).

    Matmul operands are cast to `mxu_dtype` (with f32 accumulation) to mirror the
    kernel's bf16 MXU numerics so the comparison tolerance can stay tight.
    """
    wih = weight_ih.astype(mxu_dtype)
    whh = weight_hh.astype(mxu_dtype)
    t2 = t.reshape(1, -1).astype(jnp.float32)
    proj_og = (jnp.dot(x.astype(mxu_dtype), wih,
                       preferred_element_type=jnp.float32) + bias_ih)
    proj = proj_og.astype(mxu_dtype)
    outs = []
    for ii in range(category_dim):
        inter = (jnp.dot(proj, whh, preferred_element_type=jnp.float32) + bias_hh)
        pre = inter if ii == 0 else inter + proj_og
        if last_layer:
            out = jax.nn.sigmoid(pre)
        else:
            to_thresh = jnp.sum(inter * t2, axis=0, keepdims=True)   # (1, R)
            out = jnp.where(to_thresh >= 0.0, pre, 0.0)
        outs.append(out)
        proj = out.astype(mxu_dtype)
    return jnp.stack(outs, axis=1)  # (B, K, R)


if __name__ == "__main__":
    # Small shapes consistent with the module
    batch = 8
    category_dim = 4
    input_size = 32
    rnn_dim = 128

    key = jax.random.PRNGKey(0)
    kx, kih, khh, kt = jax.random.split(key, 4)

    x = jax.random.normal(kx, (batch, input_size), dtype=jnp.float32)

    # Deterministic synthetic init (init_linear is not provided; use a simple
    # fan-in uniform init for the weights, zero biases).
    bnd_ih = 1.0 / jnp.sqrt(jnp.float32(input_size))
    bnd_hh = 1.0 / jnp.sqrt(jnp.float32(rnn_dim))
    weight_ih = jax.random.uniform(kih, (input_size, rnn_dim),
                                   minval=-bnd_ih, maxval=bnd_ih, dtype=jnp.float32)
    weight_hh = jax.random.uniform(khh, (rnn_dim, rnn_dim),
                                   minval=-bnd_hh, maxval=bnd_hh, dtype=jnp.float32)
    bias_ih = jnp.zeros((rnn_dim,), dtype=jnp.float32)
    bias_hh = jnp.zeros((rnn_dim,), dtype=jnp.float32)

    # t parameter: alternating +/- pattern from random signs, as in __init__
    t_half = jax.random.randint(kt, (rnn_dim // 2,), 0, 2).astype(jnp.float32) * 2.0 - 1.0
    t = jnp.zeros((1, rnn_dim), dtype=jnp.float32)
    t = t.at[0, ::2].set(t_half).at[0, 1::2].set(-t_half)

    out = recurrent_forward(x, weight_ih, bias_ih, weight_hh, bias_hh, t,
                            category_dim=category_dim, last_layer=False)
    out = jax.block_until_ready(out)

    ref = recurrent_reference(x, weight_ih, bias_ih, weight_hh, bias_hh, t,
                              category_dim=category_dim, last_layer=False)
    assert out.shape == (batch, category_dim, rnn_dim)
    max_diff = float(jnp.max(jnp.abs(out - ref)))
    assert jnp.allclose(out, ref, atol=1e-4, rtol=1e-4), (
        "mismatch vs bf16-MXU JAX reference; max abs diff = %g" % max_diff)

    # TODO(synk): the PyTorch first_rec_layer+last_layer path leaves `proj`
    # undefined for category_dim > 1 (would raise in torch); and the 3-D-input
    # first_rec_layer path shape-mismatches on assignment — neither is modeled.
    print("KERNEL_OK")
</pallas_src>

<mosaic_0001>
module attributes {stable_mosaic.version = 11 : i64} {
  func.func @recurrent_kernel(%arg0: i32, %arg1: memref<16x32xbf16, #tpu.memory_space<vmem>>, %arg2: memref<32x128xbf16, #tpu.memory_space<vmem>>, %arg3: memref<1x128xf32, #tpu.memory_space<vmem>>, %arg4: memref<128x128xbf16, #tpu.memory_space<vmem>>, %arg5: memref<1x128xf32, #tpu.memory_space<vmem>>, %arg6: memref<16x128xf32, #tpu.memory_space<vmem>>, %arg7: memref<1x16x128xf32, #tpu.memory_space<vmem>>, %arg8: memref<16x128xbf16, #tpu.memory_space<vmem>>, %arg9: memref<16x128xf32, #tpu.memory_space<vmem>>) attributes {dimension_semantics = [#tpu.dimension_semantics<arbitrary>], iteration_bounds = array<i64: 4>, scalar_prefetch = 0 : i64, scratch_operands = 2 : i64, tpu.core_type = #tpu.core_type<tc>, window_params = [{pipeline_mode = #tpu.pipeline_mode<synchronous>, transform_indices = @transform_0, window_bounds = array<i64: 16, 32>}, {pipeline_mode = #tpu.pipeline_mode<synchronous>, transform_indices = @transform_1, window_bounds = array<i64: 32, 128>}, {pipeline_mode = #tpu.pipeline_mode<synchronous>, transform_indices = @transform_2, window_bounds = array<i64: 1, 128>}, {pipeline_mode = #tpu.pipeline_mode<synchronous>, transform_indices = @transform_3, window_bounds = array<i64: 128, 128>}, {pipeline_mode = #tpu.pipeline_mode<synchronous>, transform_indices = @transform_4, window_bounds = array<i64: 1, 128>}, {pipeline_mode = #tpu.pipeline_mode<synchronous>, transform_indices = @transform_5, window_bounds = array<i64: 16, 128>}, {transform_indices = @transform_6, window_bounds = array<i64: 1, 16, 128>}]} {
    %c0_i32 = arith.constant 0 : i32
    %0 = arith.cmpi eq, %arg0, %c0_i32 : i32
    %1 = arith.extui %0 : i1 to i32
    %c0_i32_0 = arith.constant 0 : i32
    %2 = arith.cmpi ne, %1, %c0_i32_0 : i32
    scf.if %2 {
      %c0_21 = arith.constant 0 : index
      %c0_22 = arith.constant 0 : index
      %30 = vector.load %arg1[%c0_21, %c0_22] : memref<16x32xbf16, #tpu.memory_space<vmem>>, vector<16x32xbf16>
      %c0_23 = arith.constant 0 : index
      %c0_24 = arith.constant 0 : index
      %31 = vector.load %arg2[%c0_23, %c0_24] : memref<32x128xbf16, #tpu.memory_space<vmem>>, vector<32x128xbf16>
      %cst_25 = arith.constant dense<0.000000e+00> : vector<16x128xf32>
      %32 = tpu.matmul %30, %31, %cst_25 {dimension_numbers = #tpu.dot_dimension_numbers<[1], [0], [0], [1], [0, 0, 1, 1], [], []>} : vector<16x32xbf16>, vector<32x128xbf16>, vector<16x128xf32> -> vector<16x128xf32>
      %c0_26 = arith.constant 0 : index
      %c0_27 = arith.constant 0 : index
      %33 = vector.load %arg3[%c0_26, %c0_27] : memref<1x128xf32, #tpu.memory_space<vmem>>, vector<1x128xf32>
      %34 = vector.broadcast %33 : vector<1x128xf32> to vector<16x128xf32>
      %35 = arith.addf %32, %34 : vector<16x128xf32>
      %c0_28 = arith.constant 0 : index
      %c0_29 = arith.constant 0 : index
      %36 = vector.load %arg9[%c0_28, %c0_29] : memref<16x128xf32, #tpu.memory_space<vmem>>, vector<16x128xf32>
      tpu.vector_store %arg9[%c0_28, %c0_29], %35 {strides = array<i32>} : memref<16x128xf32, #tpu.memory_space<vmem>>, vector<16x128xf32>,
      %37 = arith.truncf %35 : vector<16x128xf32> to vector<16x128xbf16>
      %c0_30 = arith.constant 0 : index
      %c0_31 = arith.constant 0 : index
      %38 = vector.load %arg8[%c0_30, %c0_31] : memref<16x128xbf16, #tpu.memory_space<vmem>>, vector<16x128xbf16>
      tpu.vector_store %arg8[%c0_30, %c0_31], %37 {strides = array<i32>} : memref<16x128xbf16, #tpu.memory_space<vmem>>, vector<16x128xbf16>,
    } else {
    }
    %c0 = arith.constant 0 : index
    %c0_1 = arith.constant 0 : index
    %3 = vector.load %arg8[%c0, %c0_1] : memref<16x128xbf16, #tpu.memory_space<vmem>>, vector<16x128xbf16>
    %c0_2 = arith.constant 0 : index
    %c0_3 = arith.constant 0 : index
    %4 = vector.load %arg4[%c0_2, %c0_3] : memref<128x128xbf16, #tpu.memory_space<vmem>>, vector<128x128xbf16>
    %cst = arith.constant dense<0.000000e+00> : vector<16x128xf32>
    %5 = tpu.matmul %3, %4, %cst {dimension_numbers = #tpu.dot_dimension_numbers<[1], [0], [0], [1], [0, 0, 1, 1], [], []>} : vector<16x128xbf16>, vector<128x128xbf16>, vector<16x128xf32> -> vector<16x128xf32>
    %c0_4 = arith.constant 0 : index
    %c0_5 = arith.constant 0 : index
    %6 = vector.load %arg5[%c0_4, %c0_5] : memref<1x128xf32, #tpu.memory_space<vmem>>, vector<1x128xf32>
    %7 = vector.broadcast %6 : vector<1x128xf32> to vector<16x128xf32>
    %8 = arith.addf %5, %7 : vector<16x128xf32>
    %c0_i32_6 = arith.constant 0 : i32
    %9 = arith.cmpi sgt, %arg0, %c0_i32_6 : i32
    %cst_7 = arith.constant 1.000000e+00 : f32
    %cst_8 = arith.constant 0.000000e+00 : f32
    %10 = arith.select %9, %cst_7, %cst_8 : f32
    %c0_9 = arith.constant 0 : index
    %c0_10 = arith.constant 0 : index
    %11 = vector.load %arg9[%c0_9, %c0_10] : memref<16x128xf32, #tpu.memory_space<vmem>>, vector<16x128xf32>
    %12 = vector.broadcast %10 : f32 to vector<16x128xf32>
    %13 = arith.mulf %12, %11 : vector<16x128xf32>
    %14 = arith.addf %8, %13 : vector<16x128xf32>
    %c0_11 = arith.constant 0 : index
    %c0_12 = arith.constant 0 : index
    %15 = vector.load %arg6[%c0_11, %c0_12] : memref<16x128xf32, #tpu.memory_space<vmem>>, vector<16x128xf32>
    %16 = arith.mulf %8, %15 : vector<16x128xf32>
    %cst_13 = arith.constant dense<0.000000e+00> : vector<128xf32>
    %17 = vector.multi_reduction <add>, %16, %cst_13 [0] : vector<16x128xf32> to vector<128xf32>
    %18 = vector.shape_cast %17 : vector<128xf32> to vector<1x128xf32>
    %cst_14 = arith.constant 0.000000e+00 : f32
    %19 = vector.broadcast %cst_14 : f32 to vector<1x128xf32>
    %20 = arith.cmpf oge, %18, %19 : vector<1x128xf32>
    %cst_15 = arith.constant 0.000000e+00 : f32
    %21 = vector.shape_cast %20 : vector<1x128xi1> to vector<1x128xi1>
    %22 = vector.broadcast %21 : vector<1x128xi1> to vector<16x128xi1>
    %23 = vector.broadcast %cst_15 : f32 to vector<16x128xf32>
    %24 = arith.select %22, %14, %23 : vector<16x128xi1>, vector<16x128xf32>
    %c0_16 = arith.constant 0 : index
    %c0_17 = arith.constant 0 : index
    %c0_18 = arith.constant 0 : index
    %25 = vector.load %arg7[%c0_16, %c0_17, %c0_18] : memref<1x16x128xf32, #tpu.memory_space<vmem>>, vector<1x16x128xf32>
    %26 = vector.shape_cast %25 : vector<1x16x128xf32> to vector<16x128xf32>
    %27 = vector.shape_cast %24 : vector<16x128xf32> to vector<1x16x128xf32>
    tpu.vector_store %arg7[%c0_16, %c0_17, %c0_18], %27 {strides = array<i32>} : memref<1x16x128xf32, #tpu.memory_space<vmem>>, vector<1x16x128xf32>,
    %28 = arith.truncf %24 : vector<16x128xf32> to vector<16x128xbf16>
    %c0_19 = arith.constant 0 : index
    %c0_20 = arith.constant 0 : index
    %29 = vector.load %arg8[%c0_19, %c0_20] : memref<16x128xbf16, #tpu.memory_space<vmem>>, vector<16x128xbf16>
    tpu.vector_store %arg8[%c0_19, %c0_20], %28 {strides = array<i32>} : memref<16x128xbf16, #tpu.memory_space<vmem>>, vector<16x128xbf16>,
    return
  }
  func.func @transform_0(%arg0: i32) -> (i32, i32) {
    %c0_i32 = arith.constant 0 : i32
    %c0_i32_0 = arith.constant 0 : i32
    %c0_i32_1 = arith.constant 0 : i32
    return %c0_i32, %c0_i32_0 : i32, i32
  }
  func.func @transform_1(%arg0: i32) -> (i32, i32) {
    %c0_i32 = arith.constant 0 : i32
    %c0_i32_0 = arith.constant 0 : i32
    %c0_i32_1 = arith.constant 0 : i32
    return %c0_i32, %c0_i32_0 : i32, i32
  }
  func.func @transform_2(%arg0: i32) -> (i32, i32) {
    %c0_i32 = arith.constant 0 : i32
    %c0_i32_0 = arith.constant 0 : i32
    %c0_i32_1 = arith.constant 0 : i32
    return %c0_i32, %c0_i32_0 : i32, i32
  }
  func.func @transform_3(%arg0: i32) -> (i32, i32) {
    %c0_i32 = arith.constant 0 : i32
    %c0_i32_0 = arith.constant 0 : i32
    %c0_i32_1 = arith.constant 0 : i32
    return %c0_i32, %c0_i32_0 : i32, i32
  }
  func.func @transform_4(%arg0: i32) -> (i32, i32) {
    %c0_i32 = arith.constant 0 : i32
    %c0_i32_0 = arith.constant 0 : i32
    %c0_i32_1 = arith.constant 0 : i32
    return %c0_i32, %c0_i32_0 : i32, i32
  }
  func.func @transform_5(%arg0: i32) -> (i32, i32) {
    %c0_i32 = arith.constant 0 : i32
    %c0_i32_0 = arith.constant 0 : i32
    %c0_i32_1 = arith.constant 0 : i32
    return %c0_i32, %c0_i32_0 : i32, i32
  }
  func.func @transform_6(%arg0: i32) -> (i32, i32, i32) {
    %c0_i32 = arith.constant 0 : i32
    %c0_i32_0 = arith.constant 0 : i32
    %c0_i32_1 = arith.constant 0 : i32
    return %arg0, %c0_i32, %c0_i32_0 : i32, i32, i32
  }
}

</mosaic_0001>

<bundles_post_ra>
// kernel: tpu_custom_call.1
= control target key start
LH: loop header
LB: loop body
LE: loop exit
PB: predicated region body
PF: predicated region fallthrough
CT: control target
= control target key end

     0   :  { %11 = vsyncpa [#allocation5], 0  ;;  %s1190_s0 = inlined_call_operand.hbm [shape: bf16[16,32], index: 0, kind: input, shape index: {}]   ;;  %s1191_s1 = inlined_call_operand.hbm [shape: bf16[32,128], index: 1, kind: input, shape index: {}]   ;;  %s1192_s2 = inlined_call_operand.vmem [shape: f32[1,128], index: 2, kind: input, shape index: {}]   ;;  %s1193_s3 = inlined_call_operand.hbm [shape: bf16[128,128], index: 3, kind: input, shape index: {}]   ;;  %s1194_s4 = inlined_call_operand.vmem [shape: f32[1,128], index: 4, kind: input, shape index: {}]   ;;  %s1195_s5 = inlined_call_operand.vmem [shape: f32[16,128], index: 5, kind: input, shape index: {}]   ;;  %s1196_s6 = inlined_call_operand.hbm [shape: f32[4,16,128], index: 6, kind: output, shape index: {}]  }
   0x1   :  { %12 = vsyncpa [#allocation8], 0 }
   0x2   :  { %13 = vsyncpa [#allocation6], 0 }
   0x3   :  { %15 = vsyncpa [#allocation6 + $0x1], 0  ;;  %s958_s21 = smov 0   ;;  %s960_s22 = smov 0  }
   0x4   :  { %s962_s23 = smov 0   ;;  %s964_s24 = smov 0  }
   0x5 LB: > { %1201 = sst [smem:[#allocation14_spill]] %s905_s23  ;;  %s979_s25 = sadd.s32 4294967295, %s909_s24   ;;  %s909_s24 = sphi %s964_s24, %s1220_s24   ;;  %s905_s23 = sphi %s962_s23, %s1217_s23   ;;  %s901_s22 = sphi %s960_s22, %s1219_s22   ;;  %s897_s21 = sphi %s958_s21, %s1218_s21  }
   0x6   : > { %s595_s26 = sadd.s32 4294967294, %s909_s24   ;;  %s983_s27 = sadd.s32 1, %s909_s24  }
   0x7   : > { %s154_s28 = sadd.s32 1, %s905_s23  ;;  %s151_s29 = ssub.s32 %s909_s24, %s983_s27 }
   0x8   : > { %p164_p0 = scmp.ne.s32.totalorder %s905_s23, %s901_s22  ;;  %p152_p1 = scmp.eq.s32.totalorder %s151_s29, 0 }
   0x9   : > { %p165_p2 = scmp.eq.s32.totalorder %s979_s25, 3  ;;  %p170_p3 = scmp.ne.s32.totalorder %s901_s22, %s897_s21 }
   0xa   : > { %p171_p4 = scmp.eq.s32.totalorder %s595_s26, 3  ;;  %p596_p7 = scmp.ge.s32.totalorder %s909_s24, 1 }
   0xb   : > { %s994_s30 = scalar_select %p152_p1, %s905_s23, %s154_s28  }
   0xc   : > { %p996_p5 = por %p165_p2, %p164_p0  ;;  %p1000_p6 = por %p171_p4, %p170_p3 }
   0xd   : > { %1202 = sst [smem:[#allocation15_spill]] %s994_s30  ;;  %p178_p8 = scmp.lt.s32.totalorder %s909_s24, 5 }
   0xe   : > { %s1203_s7 = scalar_select %p996_p5, 1, 0 }
   0xf   : > { %s1204_s8 = scalar_select %p1000_p6, 1, 0 }
  0x10   : > { %p1197_p10 = scmp.eq.s32.totalorder %s979_s25, 0  ;;  %p1008_p11 = pnand %p596_p7, %p178_p8 }
  0x11   : > { %s911_s10 = smov [#allocation7]   ;;  %s912_s13 = smov [#allocation4]  }
  0x12   : > { %s1205_s9 = scalar_select %p1008_p11, 1, 0 }
  0x13   : > { %p680_p12 = pneg %p1008_p11  ;;  %s203_s11 = sshll.u32 %s911_s10, 4  ;;  %s1014_s11 = int_to_ptr.vmem [resolvable:$true] %s203_s11 }
  0x14   : > { %s190_s14 = sshll.u32 %s912_s13, 4  ;;  %s913_s15 = smov [#allocation9]   ;;  %s1022_s14 = int_to_ptr.vmem [resolvable:$true] %s190_s14 }
  0x15   : > { %p1018_p13 = pnand %p1197_p10, %p680_p12  ;;  %s1024_s16 = sshll.u32 %s913_s15, 4  ;;  %s220_s16 = int_to_ptr.vmem [resolvable:$true] %s1024_s16 }
  0x16   : > { %s755_s19 = scalar_lea.hbm %s1191_s1, 256 }
  0x17   : > { %p756_p0 = scmp.ne.s32.totalorder %s1191_s1, %s755_s19  ;;  %p1034_p1 = pneg %p1018_p13 }
  0x18   : > { %p762_p4 = scmp.lt.u32.totalorder %s755_s19, %s1191_s1 }
  0x19   : > { %p758_p2 = pnand %p1034_p1, %p756_p0 }
  0x1b   : > { %p759_p3 = pneg %p758_p2 }
  0x1d   : > { %p764_p7 = pnand %p762_p4, %p759_p3 }
  0x1f   : > { %767 = shalt.err (!%p764_p7)
}
  0x20   : > { %s768_s13 = scalar_lea.vmem %s1014_s11, 256  ;;  %p776_p10 = scmp.lt.s32.totalorder %s1014_s11, %s1014_s11 }
  0x21   : > { %p769_p8 = scmp.ne.s32.totalorder %s1014_s11, %s768_s13  ;;  %p777_p6 = scmp.lt.s32.totalorder %s768_s13, %s768_s13 }
  0x23   : > { %p771_p12 = pnand %p769_p8, %p1034_p1  ;;  %p778_p0 = por %p777_p6, %p776_p10 }
  0x25   : > { %p772_p9 = pneg %p771_p12 }
  0x27   : > { %p779_p2 = pnand %p778_p0, %p772_p9 }
  0x29   : > { %782 = shalt.err (!%p779_p2)
}
  0x2a   : > { %s914_s15 = smov 64   ;;  %s915_s17 = smov 4  }
  0x2b   : > { %686 = dma.hbm_to_vmem [thread:$0]  (!%p1018_p13), %s1191_s1, 256, %s1014_s11, [#allocation8], %s914_s15, %s914_s15, %s915_s17  }
  0x2c   : > { %s783_s29 = scalar_lea.hbm %s1190_s0, 128 }
  0x2d   : > { %p784_p6 = scmp.ne.s32.totalorder %s1190_s0, %s783_s29  ;;  %p790_p3 = scmp.lt.u32.totalorder %s783_s29, %s1190_s0 }
  0x2f   : > { %p786_p9 = pnand %p784_p6, %p1034_p1 }
  0x31   : > { %p787_p10 = pneg %p786_p9 }
  0x33   : > { %p792_p4 = pnand %p790_p3, %p787_p10 }
  0x35   : > { %795 = shalt.err (!%p792_p4)
}
  0x36   : > { %s796_s11 = scalar_lea.vmem %s1022_s14, 128  ;;  %p804_p0 = scmp.lt.s32.totalorder %s1022_s14, %s1022_s14 }
  0x37   : > { %p797_p7 = scmp.ne.s32.totalorder %s1022_s14, %s796_s11  ;;  %p805_p2 = scmp.lt.s32.totalorder %s796_s11, %s796_s11 }
  0x39   : > { %p799_p8 = pnand %p797_p7, %p1034_p1  ;;  %p806_p6 = por %p805_p2, %p804_p0 }
  0x3b   : > { %p800_p12 = pneg %p799_p8 }
  0x3d   : > { %p807_p9 = pnand %p806_p6, %p800_p12 }
  0x3f   : > { %810 = shalt.err (!%p807_p9)
}
  0x40   : > { %683 = dma.hbm_to_vmem [thread:$0]  (!%p1018_p13), %s1190_s0, 128, %s1022_s14, [#allocation5], %s914_s15, %s914_s15, %s915_s17  }
  0x41   : > { %s811_s20 = scalar_lea.hbm %s1193_s3, 1024 }
  0x42   : > { %p812_p10 = scmp.ne.s32.totalorder %s1193_s3, %s811_s20  ;;  %p818_p7 = scmp.lt.u32.totalorder %s811_s20, %s1193_s3 }
  0x44   : > { %p814_p3 = pnand %p812_p10, %p1034_p1 }
  0x46   : > { %p815_p4 = pneg %p814_p3 }
  0x48   : > { %p820_p8 = pnand %p818_p7, %p815_p4 }
  0x4a   : > { %823 = shalt.err (!%p820_p8)
}
  0x4b   : > { %s824_s11 = scalar_lea.vmem %s220_s16, 1024  ;;  %p832_p6 = scmp.lt.s32.totalorder %s220_s16, %s220_s16 }
  0x4c   : > { %p825_p12 = scmp.ne.s32.totalorder %s220_s16, %s824_s11  ;;  %p833_p9 = scmp.lt.s32.totalorder %s824_s11, %s824_s11 }
  0x4e   : > { %p827_p0 = pnand %p825_p12, %p1034_p1  ;;  %p834_p5 = por %p833_p9, %p832_p6 }
  0x50   : > { %p828_p2 = pneg %p827_p0 }
  0x52   : > { %p835_p11 = pnand %p834_p5, %p828_p2 }
  0x54   : > { %838 = shalt.err (!%p835_p11)
}
  0x55   : > { %689 = dma.hbm_to_vmem [thread:$0]  (!%p1018_p13), %s1193_s3, 1024, %s220_s16, [#allocation8], %s914_s15, %s914_s15, %s915_s17  }
  0x56   : > { %p1208_p10 = scmp.ne.s32.totalorder %s1205_s9, 0 }
  0x57   : > { %p1209_p1 = scmp.eq.s32.totalorder (!%p1208_p10), %s979_s25, 0 }
  0x58   : > { %241 = sbr.rel (%p1208_p10) target bundleno = 610 (0x262), region = 44 }
  0x5f   : > { %884 = dma.done.wait (%p1209_p1), [#allocation5], 128   ;;  %p1210_p3 = pmov %p1209_p1 }
  0x60   : > { %p1211_p5 = pmov %p1209_p1 }
  0x61   : > { %886 = vsyncadd (%p1210_p3), [#allocation5], 4294967168 }
  0x62   : > { %888 = dma.done.wait (%p1211_p5), [#allocation8], 1280   ;;  %p1212_p11 = pmov %p1209_p1 }
  0x63   : > { %s271_s12 = sand.u32 1, %s901_s22   ;;  %p1213_p13 = scmp.ne.s32.totalorder %s979_s25, 0 }
  0x64   : > { %890 = vsyncadd (%p1212_p11), [#allocation8], 4294966016  ;;  %s604_s16 = sshll.u32 %s271_s12, 4  ;;  %v744_v0 = vld [vmem:[#allocation7] sm:$0xff] (!%p1213_p13)   ;;  %v916_v1 = vmov (!%p1213_p13), 0.0   ;;  %v745_v2 = vld [vmem:[#allocation7 + $0x8] sm:$0xff] (!%p1213_p13)  }
  0x65   : > { %s1119_s28 = scalar_lea.vmem [#allocation10], %s604_s16  ;;  %278 = sbr.rel (%p1213_p13) target bundleno = 328 (0x148), region = 60  ;;  %638 = vmatprep.subr.bf16.mxu0 (!%p1213_p13), %v916_v1  ;;  %vm917_vm0 = vmmov (!%p1213_p13), 0   ;;  %v746_v3 = vld [vmem:[#allocation4] sm:$0xff] (!%p1213_p13)   ;;  %vm309_vm1 = vcmask (!%p1213_p13), 261120  }
  0x66   : > { %639 = vmatpush3.bf16.msra.mxu0 (!%p1213_p13), %v744_v0  ;;  %642 = vmatprep.mubr.msk.bf16.mxu0 (!%p1213_p13), %vm917_vm0, %v916_v1  ;;  %v606_v4 = vld [vmem:[%s1192_s2] ss:$0 sm:$0xff] (!%p1213_p13) }
  0x67   : > { %640 = vmatprep.subr.bf16.mxu0 (!%p1213_p13), %v916_v1 }
  0x6a   : > { %641 = vmatpush3.bf16.msra.mxu0 (!%p1213_p13), %v745_v2 }
  0x6d   : > { %643 = vmatmul.mubr.msk.bf16.vlgmr.msra.gmra.mrb[0].mxu0 %vm309_vm1, %v746_v3 }
 0x140   : > { %v347_v5 = vpop.f32.mrb[0].mxu0 }
 0x141   : > { %v348_v6 = vadd.f32 %v606_v4, %v347_v5  ;;  %v644_v7 = vpop.f32.mrb[1].mxu0 }
 0x142   : > { %v350_v8 = vpop.f32.mrb[2].mxu0 }
 0x143   : > { %354 = vst [vmem:[#allocation3] sm:$0xff] %v348_v6  ;;  %v351_v9 = vadd.f32 %v606_v4, %v350_v8  ;;  %v645_v10 = vpop.f32.mrb[3].mxu0 }
 0x145   : > { %355 = vst [vmem:[#allocation3 + $0x8] sm:$0xff] %v351_v9  ;;  %v356_v11 = vpack.c.bf16 %v351_v9, %v348_v6 }
 0x147   : > { %357 = vst [vmem:[#allocation2] sm:$0xff] %v356_v11 }
 0x148 PF: > { %v747_v12 = vld [vmem:[#allocation9] sm:$0xff]   ;;  %v918_v13 = vmov 0.0   ;;  %v748_v14 = vld [vmem:[#allocation9 + $0x8] sm:$0xff]   ;;  %vm919_vm2 = vmmov 0   ;;  %v749_v15 = vld [vmem:[#allocation9 + $0x10] sm:$0xff]   ;;  %p471_p4 = scmp.gt.s32.totalorder %s979_s25, 0 }
 0x149   : > { %646 = vmatprep.subr.bf16.mxu0 %v918_v13  ;;  %662 = vmatprep.mubr.msk.bf16.mxu0 %vm919_vm2, %v918_v13  ;;  %v750_v16 = vld [vmem:[#allocation9 + $0x18] sm:$0xff]   ;;  %v751_v17 = vld [vmem:[#allocation9 + $0x20] sm:$0xff]   ;;  %v752_v18 = vld [vmem:[#allocation9 + $0x28] sm:$0xff]   ;;  %s625_s10 = sshll.u32 %s979_s25, 8  ;;  %s514_s13 = sshll.u32 %s1119_s28, 4  ;;  %s1143_s13 = int_to_ptr.vmem [resolvable:$true] %s514_s13 }
 0x14a   : > { %647 = vmatpush3.bf16.msra.mxu0 %v747_v12  ;;  %v753_v19 = vld [vmem:[#allocation9 + $0x30] sm:$0xff]   ;;  %v754_v20 = vld [vmem:[#allocation9 + $0x38] sm:$0xff]   ;;  %v611_v22 = vld [vmem:[%s1194_s4] ss:$0 sm:$0xff]  ;;  %s472_s29 = scalar_select %p471_p4, 1.0, 0.0 }
 0x14b   : > { %648 = vmatprep.subr.bf16.mxu0 %v918_v13  ;;  %v480_v26 = vld [vmem:[%s1195_s5] sm:$0xff]  ;;  %v481_v28 = vld [vmem:[%s1195_s5 + $0x8] sm:$0xff]  ;;  %v473_v36 = vld [vmem:[#allocation3] sm:$0xff]  ;;  %s1141_s23 = scalar_lea.hbm %s1196_s6, %s625_s10  ;;  %s1149_s25 = scalar_lea.sflag [#allocation6], %s271_s12 }
 0x14c   : > { %v475_v37 = vstv %s472_s29  ;;  %v474_v38 = vld [vmem:[#allocation3 + $0x8] sm:$0xff]  ;;  %s839_s16 = scalar_lea.vmem %s1143_s13, 256  ;;  %p1214_p8 = scmp.ne.s32.totalorder %s1203_s7, 0 }
 0x14d   : > { %v476_v41 = vmul.f32 %v475_v37, %v473_v36  ;;  %v477_v42 = vmul.f32 %v475_v37, %v474_v38  ;;  %p840_p7 = scmp.ne.s32.totalorder %s1143_s13, %s839_s16  ;;  %s920_s9 = smov [#allocation10]  }
 0x14e   : > { %649 = vmatpush3.bf16.msra.mxu0 %v748_v14  ;;  %v358_v21 = vld [vmem:[#allocation2] sm:$0xff]  ;;  %s843_s15 = sshll.u32 %s920_s9, 4  ;;  %s844_s15 = int_to_ptr.vmem [resolvable:$false] %s843_s15 }
 0x14f   : > { %650 = vmatprep.subr.bf16.mxu0 %v918_v13  ;;  %p841_p12 = pnand %p840_p7, %p1214_p8  ;;  %s845_s17 = scalar_lea.vmem %s844_s15, 512 }
 0x150   : > { %p846_p2 = scmp.lt.s32.totalorder %s1143_s13, %s844_s15  ;;  %p847_p6 = scmp.lt.s32.totalorder %s845_s17, %s839_s16 }
 0x151   : > { %p842_p0 = pneg %p841_p12 }
 0x152   : > { %651 = vmatpush3.bf16.msra.mxu0 %v749_v15  ;;  %p848_p9 = por %p847_p6, %p846_p2 }
 0x153   : > { %652 = vmatprep.subr.bf16.mxu0 %v918_v13 }
 0x154   : > { %p849_p10 = pnand %p848_p9, %p842_p0 }
 0x156   : > { %653 = vmatpush3.bf16.msra.mxu0 %v750_v16 }
 0x157   : > { %654 = vmatprep.subr.bf16.mxu0 %v918_v13 }
 0x15a   : > { %655 = vmatpush3.bf16.msra.mxu0 %v751_v17 }
 0x15b   : > { %656 = vmatprep.subr.bf16.mxu0 %v918_v13 }
 0x15e   : > { %657 = vmatpush3.bf16.msra.mxu0 %v752_v18 }
 0x15f   : > { %658 = vmatprep.subr.bf16.mxu0 %v918_v13 }
 0x162   : > { %659 = vmatpush3.bf16.msra.mxu0 %v753_v19 }
 0x163   : > { %660 = vmatprep.subr.bf16.mxu0 %v918_v13 }
 0x166   : > { %661 = vmatpush3.bf16.msra.mxu0 %v754_v20 }
 0x169   : > { %663 = vmatmul.mubr.bf16.vlgmr.msra.gmra.mrb[0].mxu0 %v358_v21 }
 0x23c   : > { %v464_v23 = vpop.f32.mrb[0].mxu0 }
 0x23d   : > { %v465_v24 = vadd.f32 %v611_v22, %v464_v23  ;;  %v664_v25 = vpop.f32.mrb[1].mxu0 }
 0x23e   : > { %v467_v27 = vpop.f32.mrb[2].mxu0 }
 0x23f   : > { %v468_v29 = vadd.f32 %v611_v22, %v467_v27  ;;  %v665_v30 = vpop.f32.mrb[3].mxu0  ;;  %v482_v31 = vmul.f32 %v480_v26, %v465_v24  ;;  %v478_v45 = vadd.f32 %v476_v41, %v465_v24 }
 0x241   : > { %v483_v32 = vmul.f32 %v481_v28, %v468_v29  ;;  %v479_v46 = vadd.f32 %v477_v42, %v468_v29 }
 0x243   : > { %v484_v33 = vadd.f32 %v483_v32, %v482_v31 }
 0x245   : > { %v485_v34 = vrot.slane %v484_v33, 4 }
 0x247   : > { %v486_v35 = vadd.f32 %v485_v34, %v484_v33 }
 0x249   : > { %v487_v39 = vrot.slane %v486_v35, 2 }
 0x24b   : > { %v488_v40 = vadd.f32 %v487_v39, %v486_v35 }
 0x24d   : > { %v489_v43 = vrot.slane %v488_v40, 1 }
 0x24f   : > { %v490_v44 = vadd.f32 %v489_v43, %v488_v40 }
 0x251   : > { %vm491_vm3 = vcmp.ge.f32.partialorder %v490_v44, 0.0 }
 0x252   : > { %v494_v47 = vsel %vm491_vm3, %v478_v45, 0.0  ;;  %v495_v48 = vsel %vm491_vm3, %v479_v46, 0.0 }
 0x253   : > { %496 = vst [vmem:[%s1119_s28] sm:$0xff] %v494_v47  ;;  %497 = vst [vmem:[%s1119_s28 + $0x8] sm:$0xff] %v495_v48  ;;  %v498_v49 = vpack.c.bf16 %v495_v48, %v494_v47 }
 0x254   : > { %852 = shalt.err (!%p849_p10)
}
 0x255   : > { %s853_s12 = scalar_lea.hbm %s1141_s23, 256  ;;  %s857_s18 = scalar_lea.hbm %s1196_s6, 1024 }
 0x256   : > { %p854_p1 = scmp.ne.s32.totalorder %s1141_s23, %s853_s12  ;;  %p858_p11 = scmp.lt.u32.totalorder %s1141_s23, %s1196_s6 }
 0x257   : > { %p859_p13 = scmp.lt.u32.totalorder %s857_s18, %s853_s12  ;;  %p861_p7 = scmp.lt.u32.totalorder %s853_s12, %s1141_s23 }
 0x258   : > { %p855_p3 = pnand %p854_p1, %p1214_p8 }
 0x259   : > { %p860_p4 = por %p859_p13, %p858_p11 }
 0x25a   : > { %p856_p5 = pneg %p855_p3 }
 0x25b   : > { %p862_p12 = por %p861_p7, %p860_p4 }
 0x25d   : > { %p863_p0 = pnand %p862_p12, %p856_p5 }
 0x25f   : > { %866 = shalt.err (!%p863_p0)
}
 0x260   : > { %s921_s26 = smov 128   ;;  %s922_s29 = smov 8   ;;  %499 = vst [vmem:[#allocation2] sm:$0xff] %v498_v49 }
 0x261   : > { %678 = dma.vmem_to_hbm [thread:$0]  (%p1214_p8), %s1143_s13, 256, %s1141_s23, %s1149_s25, %s921_s26, %s921_s26, %s922_s29  }
 0x262 PF: > { %p700_p2 = scmp.ge.s32.totalorder %s909_s24, 2  ;;  %s529_s10 = sand.u32 1, %s897_s21  }
 0x263   : > { %p1215_p6 = scmp.ne.s32.totalorder %s1204_s8, 0  ;;  %s530_s11 = scalar_lea.sflag [#allocation6], %s529_s10 }
 0x265   : > { %p691_p9 = pnand %p700_p2, %p1215_p6 }
 0x267   : > { %892 = dma.done.wait (!%p691_p9), %s530_s11, 256  }
 0x268   : > { %894 = vsyncadd (!%p691_p9), %s530_s11, 4294967040  ;;  %s1216_s14 = sld [smem:[#allocation14_spill]]  ;;  %s1217_s23 = sld [smem:[#allocation15_spill]] }
 0x269   : > { %p18_p10 = scmp.ge.s32.totalorder %s983_s27, 6   ;;  %s1218_s21 = smov %s901_s22 }
 0x26a   : > { %s1220_s24 = smov %s983_s27 }
 0x26b   :  { %20 = sbr.rel (!%p18_p10) target bundleno = 5 (0x5), region = 93 }
 0x26e   : > { %s1219_s22 = smov %s1216_s14 }
 0x272   :  { %535 = vsyncpa [#allocation5], 1 }
 0x273   :  { %537 = vsyncpa [#allocation5 + $0x1], 1 }
 0x274   :  { %538 = vsyncpa [#allocation8], 1 }
 0x275   :  { %539 = vsyncpa [#allocation6], 1 }
 0x276   :  { %541 = vsyncpa [#allocation6 + $0x1], 1 }

</bundles_post_ra>
